<compile_context>
chip_gen: v7x
topology: tpu7x:2x2x1
jax: 0.10.0
libtpu: 0.0.40
codegen_flags: <defaults>
</compile_context>

<pallas_src>
import functools

import jax
import jax.numpy as jnp
from jax import lax
from jax.experimental import pallas as pl
from jax.experimental.pallas import tpu as pltpu


def _spd_flat_kernel(x_ref, o_ref, *, D, epsilon):
    # x_ref / o_ref: (BT, D*D) lane-dense VMEM tiles (row-major flattened mats).
    xl = x_ref[...]                                  # native dtype
    bt = xl.shape[0]

    # trace(X X^T) == ||X||_F^2 == sum(x*x), computed on the lane-dense view
    # (full 128-lane occupancy).  No dependency on the MXU result, so it
    # overlaps the matmul below.
    xf = xl.astype(jnp.float32)
    trace = jnp.sum(xf * xf, axis=-1, keepdims=True)             # (BT, 1)

    # X @ X^T per matrix, accumulated in f32 on the MXU (batched einsum).
    # Operands stay in their native dtype (bf16 keeps the fast MXU path).
    x = xl.reshape(bt, D, D)
    s = jnp.einsum("bij,bkj->bik", x, x,
                   preferred_element_type=jnp.float32)           # (BT, D, D) f32

    # Identity tile built once per block (single iota compare, no gather).
    row = lax.broadcasted_iota(jnp.int32, (D, D), 0)
    col = lax.broadcasted_iota(jnp.int32, (D, D), 1)
    eye = (row == col).astype(jnp.float32)                       # (D, D)

    out = s + (epsilon * trace[:, :, None]) * eye[None, :, :]
    # Store through the lane-dense flattened layout -> unmasked full-width vst.
    o_ref[...] = out.reshape(bt, D * D).astype(o_ref.dtype)

    # TODO(synk): clamp_eigenvalues=True branch (torch.linalg.eigh) has no
    # clean Pallas/TPU equivalent; only the default (False) path is implemented.


def _spd_3d_kernel(x_ref, o_ref, *, epsilon):
    # Fallback for lane-aligned D (D % 128 == 0): blocks are already lane-dense.
    x = x_ref[...]
    D = x.shape[-1]

    xf = x.astype(jnp.float32)
    trace = jnp.sum(xf * xf, axis=(-2, -1), keepdims=True)       # (BT, 1, 1)

    s = jnp.einsum("bij,bkj->bik", x, x, preferred_element_type=jnp.float32)

    row = lax.broadcasted_iota(jnp.int32, (D, D), 0)
    col = lax.broadcasted_iota(jnp.int32, (D, D), 1)
    eye = (row == col).astype(jnp.float32)

    o_ref[...] = (s + (epsilon * trace) * eye[None, :, :]).astype(o_ref.dtype)


def _round_up(x, m):
    return -(-x // m) * m


def _pick_batch_tile(B, D, itemsize, budget_bytes=14 * 1024 * 1024):
    """How many DxD matrices to process per grid step.

    The budget covers the 2x double-buffered in/out lane-dense blocks plus the
    lane/sublane-padded in-kernel temporaries (the (BT, D, D) MXU feed, the f32
    matmul result and the shifted output before the store reshape).  ~14 MiB of
    accounted data keeps the kernel safely inside a 32 MiB scoped-VMEM limit on
    every generation (v5e/v6e 128 MiB physical, v7x 64 MiB per TC).
    """
    sub_tile = 8 * max(1, 4 // max(1, itemsize))     # 8 f32, 16 bf16, 32 int8
    lane_row = _round_up(D * D, 128)
    io_per_mat = 4 * lane_row * itemsize             # 2 in + 2 out pipeline bufs
    pad_native = _round_up(D, sub_tile) * _round_up(D, 128) * itemsize
    pad_f32 = _round_up(D, 8) * _round_up(D, 128) * 4
    tmp_per_mat = pad_native + 3 * pad_f32           # reshaped x, s, out (padded)
    bt = max(1, budget_bytes // (io_per_mat + tmp_per_mat))
    # Keep at least ~4 grid steps so v7x can shard the batch axis across both
    # TensorCores and the DMA pipeline has iterations to overlap.
    bt = min(bt, max(sub_tile, _round_up(pl.cdiv(B, 4), sub_tile)))
    if bt >= B:
        return B                                     # one block == full array dim
    return max(sub_tile, (bt // sub_tile) * sub_tile)


def fast_spd_form(x, epsilon=0.001):
    """Pallas implementation of FastSPDForm.forward (clamp_eigenvalues=False)."""
    *batch_dims, D1, D2 = x.shape
    assert D1 == D2, "FastSPDForm expects square matrices (..., D, D)"
    D = D1
    B = 1
    for d in batch_dims:
        B *= d
    itemsize = x.dtype.itemsize

    BT = _pick_batch_tile(B, D, itemsize)
    grid = (pl.cdiv(B, BT),)
    cost = pl.CostEstimate(
        flops=2 * B * D * D * D,
        transcendentals=0,
        bytes_accessed=2 * B * D * D * itemsize,
    )
    cparams = pltpu.CompilerParams(
        dimension_semantics=("parallel",),
        vmem_limit_bytes=32 * 1024 * 1024,
    )

    if D % 128 == 0:
        # D already lane-aligned: keep (BT, D, D) blocks (no padding waste).
        x_flat = x.reshape(B, D, D)
        kernel = functools.partial(_spd_3d_kernel, epsilon=epsilon)
        out_flat = pl.pallas_call(
            kernel,
            out_shape=jax.ShapeDtypeStruct((B, D, D), x.dtype),
            grid_spec=pltpu.PrefetchScalarGridSpec(
                num_scalar_prefetch=0,
                grid=grid,
                in_specs=[pl.BlockSpec((BT, D, D), lambda b: (b, 0, 0))],
                out_specs=pl.BlockSpec((BT, D, D), lambda b: (b, 0, 0)),
            ),
            compiler_params=cparams,
            cost_estimate=cost,
        )(x_flat)
        return out_flat.reshape(*batch_dims, D, D)

    # Lane-dense path for small / unaligned D: matrices flattened to rows of
    # D*D (row-major reshape of contiguous memory -> free in the wrapper), so
    # each block is one contiguous DMA and the store is unmasked full-width.
    x_flat = x.reshape(B, D * D)
    kernel = functools.partial(_spd_flat_kernel, D=D, epsilon=epsilon)
    out_flat = pl.pallas_call(
        kernel,
        out_shape=jax.ShapeDtypeStruct((B, D * D), x.dtype),
        grid_spec=pltpu.PrefetchScalarGridSpec(
            num_scalar_prefetch=0,
            grid=grid,
            in_specs=[pl.BlockSpec((BT, D * D), lambda b: (b, 0))],
            out_specs=pl.BlockSpec((BT, D * D), lambda b: (b, 0)),
        ),
        compiler_params=cparams,
        cost_estimate=cost,
    )(x_flat)
    return out_flat.reshape(*batch_dims, D, D)


def _reference(x, epsilon=0.001):
    x = x.astype(jnp.float32)
    x_sym = jnp.einsum("...ij,...kj->...ik", x, x)
    trace = jnp.trace(x_sym, axis1=-2, axis2=-1)[..., None, None]
    eye = jnp.eye(x.shape[-1], dtype=x.dtype)
    return x_sym + epsilon * trace * eye


if __name__ == "__main__":
    key = jax.random.PRNGKey(0)

    # Small shape consistent with (..., D, D): batch dims (2, 4), D = 16.
    x = jax.random.normal(key, (2, 4, 16, 16), dtype=jnp.float32)
    out = jax.block_until_ready(fast_spd_form(x, epsilon=0.001))
    ref = _reference(x, epsilon=0.001)
    assert out.shape == x.shape
    assert jnp.allclose(out, ref, atol=1e-4, rtol=1e-4), "mismatch vs reference"

    # Ragged-grid check (B not a multiple of the batch tile -> clipped block).
    x2 = jax.random.normal(jax.random.PRNGKey(1), (40, 16, 16), dtype=jnp.float32)
    out2 = jax.block_until_ready(fast_spd_form(x2, epsilon=0.001))
    ref2 = _reference(x2, epsilon=0.001)
    assert out2.shape == x2.shape
    assert jnp.allclose(out2, ref2, atol=1e-4, rtol=1e-4), "ragged mismatch"

    print("KERNEL_OK")
</pallas_src>

<mosaic_0001>
module attributes {stable_mosaic.version = 11 : i64} {
  func.func @_spd_flat_kernel(%arg0: i32, %arg1: memref<8x256xf32, #tpu.memory_space<vmem>>, %arg2: memref<8x256xf32, #tpu.memory_space<vmem>>) attributes {dimension_semantics = [#tpu.dimension_semantics<parallel>], iteration_bounds = array<i64: 1>, scalar_prefetch = 0 : i64, scratch_operands = 0 : i64, tpu.core_type = #tpu.core_type<tc>, window_params = [{transform_indices = @transform_0, window_bounds = array<i64: 8, 256>}, {transform_indices = @transform_1, window_bounds = array<i64: 8, 256>}]} {
    %c0 = arith.constant 0 : index
    %c0_0 = arith.constant 0 : index
    %0 = vector.load %arg1[%c0, %c0_0] : memref<8x256xf32, #tpu.memory_space<vmem>>, vector<8x256xf32>
    %1 = arith.mulf %0, %0 : vector<8x256xf32>
    %cst = arith.constant dense<0.000000e+00> : vector<8xf32>
    %2 = vector.multi_reduction <add>, %1, %cst [1] : vector<8x256xf32> to vector<8xf32>
    %3 = vector.shape_cast %2 : vector<8xf32> to vector<8x1xf32>
    %4 = vector.shape_cast %0 : vector<8x256xf32> to vector<8x16x16xf32>
    "tpu.trace_start"() <{level = 10 : i32, message = "bij,bkj->bik"}> : () -> ()
    %cst_1 = arith.constant dense<0.000000e+00> : vector<8x16x16xf32>
    %5 = tpu.matmul %4, %4, %cst_1 {dimension_numbers = #tpu.dot_dimension_numbers<[2], [2], [1], [1], [0, 0, 0, 1, 1, 1], [0], [0]>} : vector<8x16x16xf32>, vector<8x16x16xf32>, vector<8x16x16xf32> -> vector<8x16x16xf32>
    "tpu.trace_stop"() : () -> ()
    %6 = tpu.iota {dimensions = array<i32: 0>} : vector<16x16xi32>
    %7 = tpu.iota {dimensions = array<i32: 1>} : vector<16x16xi32>
    %8 = arith.cmpi eq, %6, %7 : vector<16x16xi32>
    %9 = arith.extui %8 : vector<16x16xi1> to vector<16x16xi32>
    %10 = arith.sitofp %9 : vector<16x16xi32> to vector<16x16xf32>
    %11 = vector.shape_cast %3 : vector<8x1xf32> to vector<8x1x1xf32>
    %cst_2 = arith.constant 1.000000e-03 : f32
    %12 = vector.broadcast %cst_2 : f32 to vector<8x1x1xf32>
    %13 = arith.mulf %12, %11 : vector<8x1x1xf32>
    %14 = vector.shape_cast %10 : vector<16x16xf32> to vector<1x16x16xf32>
    %15 = vector.broadcast %13 : vector<8x1x1xf32> to vector<8x16x16xf32>
    %16 = vector.broadcast %14 : vector<1x16x16xf32> to vector<8x16x16xf32>
    %17 = arith.mulf %15, %16 : vector<8x16x16xf32>
    %18 = arith.addf %5, %17 : vector<8x16x16xf32>
    %19 = vector.shape_cast %18 : vector<8x16x16xf32> to vector<8x256xf32>
    %c0_3 = arith.constant 0 : index
    %c0_4 = arith.constant 0 : index
    %20 = vector.load %arg2[%c0_3, %c0_4] : memref<8x256xf32, #tpu.memory_space<vmem>>, vector<8x256xf32>
    tpu.vector_store %arg2[%c0_3, %c0_4], %19 {strides = array<i32>} : memref<8x256xf32, #tpu.memory_space<vmem>>, vector<8x256xf32>,
    return
  }
  func.func @transform_0(%arg0: i32) -> (i32, i32) {
    %c0_i32 = arith.constant 0 : i32
    %c0_i32_0 = arith.constant 0 : i32
    return %arg0, %c0_i32 : i32, i32
  }
  func.func @transform_1(%arg0: i32) -> (i32, i32) {
    %c0_i32 = arith.constant 0 : i32
    %c0_i32_0 = arith.constant 0 : i32
    return %arg0, %c0_i32 : i32, i32
  }
}

</mosaic_0001>

<bundles_post_ra>
// kernel: tpu_custom_call.1
= control target key start
LH: loop header
LB: loop body
LE: loop exit
PB: predicated region body
PF: predicated region fallthrough
CT: control target
= control target key end

     0   :  { %6 = vsyncpa [#allocation3], 0  ;;  %s1974_s0 = inlined_call_operand.hbm [shape: f32[8,256], index: 0, kind: input, shape index: {}]   ;;  %s1975_s1 = inlined_call_operand.hbm [shape: f32[8,256], index: 1, kind: output, shape index: {}]  }
   0x1   :  { %7 = vsyncpa [#allocation4], 0  ;;  %s1664_s6 = smov [#allocation2]   ;;  %s1616_s10 = scalar_lea.hbm %s1974_s0, 256 }
   0x2   :  { %s14_s7 = sshll.u32 %s1664_s6, 4  ;;  %p1617_p0 = scmp.ne.s32.totalorder %s1974_s0, %s1616_s10  ;;  %s15_s7 = int_to_ptr.vmem [resolvable:$true] %s14_s7 }
   0x3   :  { %p1620_p1 = scmp.lt.u32.totalorder %s1616_s10, %s1974_s0 }
   0x5   :  { %p1622_p2 = pnand %p1620_p1, %p1617_p0 }
   0x7   :  { %1625 = shalt.err (!%p1622_p2)
}
   0x8   :  { %s1626_s15 = scalar_lea.vmem %s15_s7, 256  ;;  %p1631_p4 = scmp.lt.s32.totalorder %s15_s7, %s15_s7 }
   0x9   :  { %p1627_p3 = scmp.ne.s32.totalorder %s15_s7, %s1626_s15  ;;  %p1632_p5 = scmp.lt.s32.totalorder %s1626_s15, %s1626_s15 }
   0xb   :  { %p1633_p6 = por %p1632_p5, %p1631_p4 }
   0xd   :  { %p1634_p7 = pnand %p1633_p6, %p1627_p3 }
   0xf   :  { %1637 = shalt.err (!%p1634_p7)
}
  0x10   :  { %17 = dma.hbm_to_vmem [thread:$0]  %s1974_s0, 256, %s15_s7, [#allocation3]  }
  0x11   :  { %1660 = dma.done.wait [#allocation3], 256  }
  0x12   :  { %1661 = vsyncadd [#allocation3], 4294967040  ;;  %v1698_v0 = vld [vmem:[#allocation2] sm:$0xff]  ;;  %s1665_s18 = smov 80   ;;  %s1666_s19 = smov 112   ;;  %v1712_v1 = vld [vmem:[#allocation2 + $0x8] sm:$0xff]  ;;  %v77_v9 = vlaneseq }
  0x13   :  { %35 = vrot.lane.b32.xlu1 %v1698_v0, %s1665_s18  ;;  %29 = vrot.lane.b32.xlu0 %v1698_v0, %s1666_s19  ;;  %s1667_s20 = smov 64   ;;  %s1668_s21 = smov 96   ;;  %v23_v2 = vmul.f32 %v1698_v0, %v1698_v0  ;;  %v24_v3 = vmul.f32 %v1712_v1, %v1712_v1  ;;  %v1672_v7 = vmov 1983009808   ;;  %v1673_v16 = vmov 1934713408  }
  0x14   :  { %s1669_s0 = smov 32   ;;  %s1670_s22 = smov 48   ;;  %v75_v8 = vunpack.c.l.s4 %v1672_v7  ;;  %v1743_v13 = vshrl.u32 %v77_v9, 7  ;;  %v139_v17 = vunpack.c.l.s4 %v1673_v16  ;;  %vm420_vm0 = vcmask 130048  }
  0x15   :  { %s1671_s23 = smov 16   ;;  %v25_v4 = vadd.f32 %v24_v3, %v23_v2  ;;  %vm1794_vm1 = vmpackc.low %vm420_vm0, %vm420_vm0  ;;  %vm1398_vm4 = vcmask 261120   ;;  %vm1400_vm5 = vcmask 392192   ;;  %vm1402_vm6 = vcmask 523264   ;;  %s1675_s24 = smov [#allocation5]  }
  0x16   :  { %v76_v12 = vunpack.c.0.s8 %v75_v8  ;;  %v140_v24 = vunpack.c.0.s8 %v139_v17  ;;  %vm1404_vm7 = vcmask 654336   ;;  %vm1408_vm8 = vcmask 916480   ;;  %s1425_s25 = sshll.u32 %s1675_s24, 4  ;;  %s1426_s25 = int_to_ptr.vmem [resolvable:$true] %s1425_s25 }
  0x17   :  { %38 = vrot.lane.b32.xlu1 %v1698_v0, %s1667_s20  ;;  %32 = vrot.lane.b32.xlu0 %v1698_v0, %s1668_s21  ;;  %vm1406_vm9 = vcmask 785408   ;;  %s1638_s26 = scalar_lea.vmem %s1426_s25, 256  ;;  %p1643_p9 = scmp.lt.s32.totalorder %s1426_s25, %s1426_s25 }
  0x18   :  { %v1750_v19 = vsub.s32 %v76_v12, %v1743_v13  ;;  %v1761_v32 = vsub.s32 %v140_v24, %v1743_v13  ;;  %p1639_p8 = scmp.ne.s32.totalorder %s1426_s25, %s1638_s26  ;;  %p1644_p10 = scmp.lt.s32.totalorder %s1638_s26, %s1638_s26 }
  0x1a   :  { %p1645_p11 = por %p1644_p10, %p1643_p9 }
  0x1b   :  { %44 = vrot.lane.b32.xlu1 %v1698_v0, %s1669_s0  ;;  %41 = vrot.lane.b32.xlu0 %v1698_v0, %s1670_s22 }
  0x1c   :  { %p1646_p12 = pnand %p1645_p11, %p1639_p8 }
  0x1f   :  { %51 = vrot.lane.b32.xlu1 %v1712_v1, %s1666_s19  ;;  %47 = vrot.lane.b32.xlu0 %v1698_v0, %s1671_s23 }
  0x23   :  { %57 = vrot.lane.b32.xlu1 %v1712_v1, %s1665_s18  ;;  %54 = vrot.lane.b32.xlu0 %v1712_v1, %s1668_s21 }
  0x27   :  { %63 = vrot.lane.b32.xlu1 %v1712_v1, %s1670_s22  ;;  %60 = vrot.lane.b32.xlu0 %v1712_v1, %s1667_s20 }
  0x2b   :  { %69 = vrot.lane.b32.xlu1 %v1712_v1, %s1671_s23  ;;  %66 = vrot.lane.b32.xlu0 %v1712_v1, %s1669_s0 }
  0x4a   :  { %26 = vadd.xlane.f32.xlu0 %v25_v4 }
  0x85   :  { %v1734_v5 = vpop.permute.xlu1 %35  ;;  %v1736_v6 = vpop.permute.xlu0 %29 }
  0x86   :  { %v88_v20 = vcombine.low %v1736_v6, %v1734_v5  ;;  %v89_v60 = vcombine.high %v1736_v6, %v1734_v5 }
  0x88   :  { %v96_v27 = vrot.slane %v88_v20, %v1750_v19 }
  0x89   :  { %v1738_v10 = vpop.permute.xlu1 %38  ;;  %v1740_v11 = vpop.permute.xlu0 %32 }
  0x8a   :  { %v72_v18 = vcombine.low %v1698_v0, %v1740_v11  ;;  %v73_v61 = vcombine.high %v1698_v0, %v1740_v11 }
  0x8c   :  { %v80_v25 = vrot.slane %v72_v18, %v1750_v19  ;;  %v87_v18 = vrot.slane %v73_v61, %v1750_v19  ;;  %v362_v61 = vsub.s32 1, %v1743_v13 }
  0x8d   :  { %v1745_v14 = vpop.permute.xlu1 %44  ;;  %v42_v15 = vpop.permute.xlu0 %41 }
  0x8e   :  { %v104_v21 = vcombine.low %v1738_v10, %v1745_v14  ;;  %v136_v33 = vcombine.low %v80_v25, %v96_v27  ;;  %v137_v56 = vcombine.high %v80_v25, %v96_v27  ;;  %v105_v2 = vcombine.high %v1738_v10, %v1745_v14 }
  0x8f   :  { %v103_v27 = vrot.slane %v89_v60, %v1750_v19 }
  0x90   :  { %v112_v29 = vrot.slane %v104_v21, %v1750_v19  ;;  %v144_v40 = vrot.slane %v136_v33, %v1761_v32  ;;  %v151_v0 = vrot.slane %v137_v56, %v1761_v32  ;;  %v119_v20 = vrot.slane %v105_v2, %v1750_v19 }
  0x91   :  { %v52_v22 = vpop.permute.xlu1 %51  ;;  %v48_v23 = vpop.permute.xlu0 %47  ;;  %v152_v33 = vcombine.low %v87_v18, %v103_v27  ;;  %v348_v2 = vand.u32 127, %v77_v9 }
  0x92   :  { %v120_v26 = vcombine.low %v42_v15, %v48_v23  ;;  %v121_v57 = vcombine.high %v42_v15, %v48_v23 }
  0x93   :  { %vm349_vm3 = vcmp.eq.s32.totalorder %v1743_v13, %v348_v2 }
  0x94   :  { %v128_v28 = vrot.slane %v120_v26, %v1750_v19  ;;  %v135_v11 = vrot.slane %v121_v57, %v1750_v19 }
  0x95   :  { %v58_v30 = vpop.permute.xlu1 %57  ;;  %v55_v31 = vpop.permute.xlu0 %54 }
  0x96   :  { %v168_v34 = vcombine.low %v112_v29, %v128_v28  ;;  %v224_v35 = vcombine.low %v52_v22, %v58_v30  ;;  %v208_v36 = vcombine.low %v1712_v1, %v55_v31  ;;  %v169_v49 = vcombine.high %v112_v29, %v128_v28 }
  0x97   :  { %v225_v58 = vcombine.high %v52_v22, %v58_v30  ;;  %v209_v59 = vcombine.high %v1712_v1, %v55_v31  ;;  %v184_v28 = vcombine.low %v119_v20, %v135_v11 }
  0x98   :  { %v176_v39 = vrot.slane %v168_v34, %v1761_v32  ;;  %v232_v41 = vrot.slane %v224_v35, %v1750_v19  ;;  %v216_v42 = vrot.slane %v208_v36, %v1750_v19  ;;  %v183_v3 = vrot.slane %v169_v49, %v1761_v32 }
  0x99   :  { %v64_v37 = vpop.permute.xlu1 %63  ;;  %v61_v38 = vpop.permute.xlu0 %60  ;;  %v239_v10 = vrot.slane %v225_v58, %v1750_v19  ;;  %v223_v12 = vrot.slane %v209_v59, %v1750_v19  ;;  %v192_v35 = vrot.slane %v184_v28, %v1761_v32  ;;  %v358_v58 = vsub.s32 0, %v1743_v13 }
  0x9a   :  { %v200_v43 = vcombine.low %v144_v40, %v176_v39  ;;  %v201_v44 = vcombine.high %v144_v40, %v176_v39  ;;  %v272_v52 = vcombine.low %v216_v42, %v232_v41  ;;  %v273_v53 = vcombine.high %v216_v42, %v232_v41 }
  0x9b   :  { %v202_v25 = vcombine.low %v151_v0, %v183_v3  ;;  %v203_v26 = vcombine.high %v151_v0, %v183_v3  ;;  %v288_v29 = vcombine.low %v223_v12, %v239_v10  ;;  %v185_v41 = vcombine.high %v119_v20, %v135_v11 }
  0x9c   :  { %1504 = vmatprep.mubr.msk.f32.mxu0 %vm420_vm0, %v200_v43  ;;  %1511 = vmatprep.mubr.msk.f32.mxu1 %vm420_vm0, %v201_v44  ;;  %v287_v8 = vrot.slane %v273_v53, %v1761_v32  ;;  %v280_v5 = vrot.slane %v272_v52, %v1761_v32  ;;  %v289_v42 = vcombine.high %v223_v12, %v239_v10  ;;  %v366_v59 = vsub.s32 2, %v1743_v13 }
  0x9d   :  { %v70_v45 = vpop.permute.xlu1 %69  ;;  %v67_v46 = vpop.permute.xlu0 %66  ;;  %v296_v36 = vrot.slane %v288_v29, %v1761_v32  ;;  %v199_v49 = vrot.slane %v185_v41, %v1761_v32  ;;  %v378_v20 = vsub.s32 5, %v1743_v13 }
  0x9e   :  { %v256_v47 = vcombine.low %v64_v37, %v70_v45  ;;  %v240_v48 = vcombine.low %v61_v38, %v67_v46  ;;  %v257_v50 = vcombine.high %v64_v37, %v70_v45  ;;  %v241_v51 = vcombine.high %v61_v38, %v67_v46 }
  0x9f   :  { %v160_v37 = vrot.slane %v152_v33, %v1761_v32  ;;  %v153_v45 = vcombine.high %v87_v18, %v103_v27 }
  0xa0   :  { %v264_v54 = vrot.slane %v256_v47, %v1750_v19  ;;  %v248_v55 = vrot.slane %v240_v48, %v1750_v19  ;;  %v271_v4 = vrot.slane %v257_v50, %v1750_v19  ;;  %v255_v7 = vrot.slane %v241_v51, %v1750_v19 }
  0xa1   :  { %v303_v50 = vrot.slane %v289_v42, %v1761_v32  ;;  %v167_v51 = vrot.slane %v153_v45, %v1761_v32 }
  0xa2   :  { %v304_v62 = vcombine.low %v248_v55, %v264_v54  ;;  %v305_v63 = vcombine.high %v248_v55, %v264_v54  ;;  %v320_v21 = vcombine.low %v255_v7, %v271_v4  ;;  %v321_v38 = vcombine.high %v255_v7, %v271_v4 }
  0xa3   :  { %v206_v54 = vcombine.low %v167_v51, %v199_v49  ;;  %v207_v55 = vcombine.high %v167_v51, %v199_v49 }
  0xa4   :  { %v319_v1 = vrot.slane %v305_v63, %v1761_v32  ;;  %v312_v6 = vrot.slane %v304_v62, %v1761_v32  ;;  %v328_v34 = vrot.slane %v320_v21, %v1761_v32  ;;  %v335_v46 = vrot.slane %v321_v38, %v1761_v32 }
  0xa5   :  { %v370_v62 = vsub.s32 3, %v1743_v13  ;;  %v346_v63 = vadd.s32 8, %v1743_v13 }
  0xa6   :  { %v336_v14 = vcombine.low %v280_v5, %v312_v6  ;;  %v337_v15 = vcombine.high %v280_v5, %v312_v6  ;;  %v338_v16 = vcombine.low %v287_v8, %v319_v1  ;;  %v339_v17 = vcombine.high %v287_v8, %v319_v1 }
  0xa7   :  { %v340_v39 = vcombine.low %v296_v36, %v328_v34  ;;  %v341_v40 = vcombine.high %v296_v36, %v328_v34  ;;  %v342_v52 = vcombine.low %v303_v50, %v335_v46  ;;  %v343_v53 = vcombine.high %v303_v50, %v335_v46 }
  0xa8   :  { %v1556_v23 = vpack.c.bf16 %v336_v14, %v200_v43  ;;  %v1562_v24 = vpack.c.bf16 %v337_v15, %v201_v44  ;;  %v1568_v30 = vpack.c.bf16 %v338_v16, %v202_v25  ;;  %v1574_v31 = vpack.c.bf16 %v339_v17, %v203_v26 }
  0xa9   :  { %v204_v43 = vcombine.low %v160_v37, %v192_v35  ;;  %v205_v44 = vcombine.high %v160_v37, %v192_v35  ;;  %v1592_v56 = vpack.c.bf16 %v342_v52, %v206_v54  ;;  %v1598_v57 = vpack.c.bf16 %v343_v53, %v207_v55 }
  0xaa   :  { %1558 = vmatprep.subr.msk.bf16.mxu0 %vm1794_vm1, %v1556_v23  ;;  %1564 = vmatprep.subr.msk.bf16.mxu1 %vm1794_vm1, %v1562_v24  ;;  %vm350_vm2 = vcmp.eq.s32.totalorder %v346_v63, %v348_v2  ;;  %v374_v6 = vsub.s32 4, %v1743_v13 }
  0xab   :  { %1561 = vmatpush3.bf16.xpose.msk.msra.mxu0 %vm1794_vm1, %v1556_v23  ;;  %1567 = vmatpush3.bf16.xpose.msk.msra.mxu1 %vm1794_vm1, %v1562_v24  ;;  %v1580_v47 = vpack.c.bf16 %v340_v39, %v204_v43  ;;  %v1586_v48 = vpack.c.bf16 %v341_v40, %v205_v44  ;;  %v382_v23 = vsub.s32 6, %v1743_v13  ;;  %v386_v24 = vsub.s32 7, %v1743_v13 }
  0xac   :  { %1570 = vmatprep.subr.msk.bf16.mxu0 %vm1794_vm1, %v1568_v30  ;;  %1576 = vmatprep.subr.msk.bf16.mxu1 %vm1794_vm1, %v1574_v31 }
  0xb2   :  { %1505 = vmatmul.mubr.msk.f32.vlgmr.msra.gmra.mrb[0].mxu0 %vm420_vm0, %v336_v14  ;;  %1512 = vmatmul.mubr.msk.f32.vlgmr.msra.gmra.mrb[0].mxu1 %vm420_vm0, %v337_v15  ;;  %v1674_v14 = vmov 0.0  }
  0xb3   :  { %1573 = vmatpush3.bf16.xpose.msk.msra.mxu0 %vm1794_vm1, %v1568_v30  ;;  %1518 = vmatprep.mubr.msk.f32.mxu0 %vm420_vm0, %v202_v25  ;;  %v1861_v15 = vsel %vm350_vm2, 1.0, %v1674_v14 }
  0xb4   :  { %1579 = vmatpush3.bf16.xpose.msk.msra.mxu1 %vm1794_vm1, %v1574_v31  ;;  %1525 = vmatprep.mubr.msk.f32.mxu1 %vm420_vm0, %v203_v26 }
  0xb5   :  { %1582 = vmatprep.subr.msk.bf16.mxu0 %vm1794_vm1, %v1580_v47  ;;  %1588 = vmatprep.subr.msk.bf16.mxu1 %vm1794_vm1, %v1586_v48 }
  0xba   :  { %1519 = vmatmul.mubr.msk.f32.vlgmr.msra.gmra.mrb[2].mxu0 %vm420_vm0, %v338_v16 }
  0xbb   :  { %1526 = vmatmul.mubr.msk.f32.vlgmr.msra.gmra.mrb[2].mxu1 %vm420_vm0, %v339_v17  ;;  %1585 = vmatpush3.bf16.xpose.msk.msra.mxu0 %vm1794_vm1, %v1580_v47  ;;  %v1863_v17 = vsel %vm349_vm3, 1.0, %v1674_v14 }
  0xbc   :  { %1532 = vmatprep.mubr.msk.f32.mxu0 %vm420_vm0, %v204_v43  ;;  %1591 = vmatpush3.bf16.xpose.msk.msra.mxu1 %vm1794_vm1, %v1586_v48 }
  0xbd   :  { %1539 = vmatprep.mubr.msk.f32.mxu1 %vm420_vm0, %v205_v44  ;;  %1594 = vmatprep.subr.msk.bf16.mxu0 %vm1794_vm1, %v1592_v56 }
  0xbe   :  { %1600 = vmatprep.subr.msk.bf16.mxu1 %vm1794_vm1, %v1598_v57 }
  0xc2   :  { %1533 = vmatmul.mubr.msk.f32.vlgmr.msra.gmra.mrb[4].mxu0 %vm420_vm0, %v340_v39 }
  0xc3   :  { %1540 = vmatmul.mubr.msk.f32.vlgmr.msra.gmra.mrb[4].mxu1 %vm420_vm0, %v341_v40  ;;  %1597 = vmatpush3.bf16.xpose.msk.msra.mxu0 %vm1794_vm1, %v1592_v56 }
  0xc4   :  { %1546 = vmatprep.mubr.msk.f32.mxu0 %vm420_vm0, %v206_v54  ;;  %1603 = vmatpush3.bf16.xpose.msk.msra.mxu1 %vm1794_vm1, %v1598_v57 }
  0xc5   :  { %1553 = vmatprep.mubr.msk.f32.mxu1 %vm420_vm0, %v207_v55 }
  0xca   :  { %1547 = vmatmul.mubr.msk.f32.vlgmr.msra.gmra.mrb[6].mxu0 %vm420_vm0, %v342_v52 }
  0xcb   :  { %1554 = vmatmul.mubr.msk.f32.vlgmr.msra.gmra.mrb[6].mxu1 %vm420_vm0, %v343_v53 }
  0xd7   :  { %v27_v60 = vpop.xlane.xlu0 %26 }
  0xd8   :  { %v359_v3 = vrot.slane %v27_v60, %v358_v58  ;;  %v367_v4 = vrot.slane %v27_v60, %v366_v59  ;;  %v363_v7 = vrot.slane %v27_v60, %v362_v61  ;;  %v371_v8 = vrot.slane %v27_v60, %v370_v62 }
  0xd9   :  { %v375_v18 = vrot.slane %v27_v60, %v374_v6  ;;  %v379_v34 = vrot.slane %v27_v60, %v378_v20  ;;  %v383_v13 = vrot.slane %v27_v60, %v382_v23  ;;  %v387_v39 = vrot.slane %v27_v60, %v386_v24 }
  0xda   :  { %v396_v0 = vmul.f32 0.001, %v359_v3  ;;  %v398_v12 = vmul.f32 0.001, %v367_v4  ;;  %v397_v16 = vmul.f32 0.001, %v363_v7 }
  0xdb   :  { %v399_v9 = vmul.f32 0.001, %v371_v8  ;;  %v400_v33 = vmul.f32 0.001, %v375_v18  ;;  %v401_v63 = vmul.f32 0.001, %v379_v34 }
  0xdc   :  { %v405_v21 = vmul.f32 %v1861_v15, %v396_v0  ;;  %v409_v22 = vmul.f32 %v1861_v15, %v398_v12  ;;  %v407_v25 = vmul.f32 %v1861_v15, %v397_v16  ;;  %v404_v26 = vmul.f32 %v1863_v17, %v396_v0 }
  0xdd   :  { %v411_v27 = vmul.f32 %v1861_v15, %v399_v9  ;;  %v408_v28 = vmul.f32 %v1863_v17, %v398_v12  ;;  %v406_v29 = vmul.f32 %v1863_v17, %v397_v16  ;;  %v410_v30 = vmul.f32 %v1863_v17, %v399_v9 }
  0xde   :  { %v402_v2 = vmul.f32 0.001, %v383_v13  ;;  %v403_v16 = vmul.f32 0.001, %v387_v39  ;;  %v413_v9 = vmul.f32 %v1861_v15, %v400_v33  ;;  %v415_v18 = vmul.f32 %v1861_v15, %v401_v63 }
  0xdf   :  { %v412_v20 = vmul.f32 %v1863_v17, %v400_v33 }
  0xe0   :  { %v419_v23 = vmul.f32 %v1861_v15, %v403_v16  ;;  %v416_v24 = vmul.f32 %v1863_v17, %v402_v2 }
 0x185   :  { %v1506_v1 = vpop.f32.mrb[0].mxu0  ;;  %v1513_v5 = vpop.f32.mrb[0].mxu1 }
 0x186   :  { %v493_v11 = vpop.f32.mrb[1].mxu0  ;;  %v574_v10 = vpop.f32.mrb[1].mxu1  ;;  %v499_v35 = vadd.f32 %v1506_v1, %v405_v21  ;;  %v580_v40 = vadd.f32 %v1513_v5, %v407_v25  ;;  %v414_v21 = vmul.f32 %v1863_v17, %v401_v63  ;;  %v418_v25 = vmul.f32 %v1863_v17, %v403_v16 }
 0x187   :  { %v494_v41 = vadd.f32 %v493_v11, %v404_v26  ;;  %v575_v45 = vadd.f32 %v574_v10, %v406_v29 }
 0x18d   :  { %v1520_v31 = vpop.f32.mrb[2].mxu0 }
 0x18e   :  { %v661_v36 = vadd.f32 %v1520_v31, %v409_v22  ;;  %v1527_v37 = vpop.f32.mrb[2].mxu1  ;;  %v655_v38 = vpop.f32.mrb[3].mxu0  ;;  %v417_v22 = vmul.f32 %v1861_v15, %v402_v2 }
 0x18f   :  { %v742_v42 = vadd.f32 %v1527_v37, %v411_v27  ;;  %v656_v43 = vadd.f32 %v655_v38, %v408_v28  ;;  %v736_v44 = vpop.f32.mrb[3].mxu1 }
 0x190   :  { %v1205_v46 = vcombine.low %v499_v35, %v661_v36  ;;  %v1206_v47 = vcombine.high %v499_v35, %v661_v36  ;;  %v737_v48 = vadd.f32 %v736_v44, %v410_v30 }
 0x191   :  { %v1221_v49 = vcombine.low %v580_v40, %v742_v42  ;;  %v1222_v50 = vcombine.high %v580_v40, %v742_v42  ;;  %v1069_v51 = vcombine.low %v494_v41, %v656_v43  ;;  %v1070_v52 = vcombine.high %v494_v41, %v656_v43 }
 0x192   :  { %v1213_v53 = vrot.slane %v1205_v46, %v1750_v19  ;;  %v1878_v54 = vrot.slane %v1206_v47, %v1750_v19  ;;  %v1085_v55 = vcombine.low %v575_v45, %v737_v48  ;;  %v1086_v56 = vcombine.high %v575_v45, %v737_v48 }
 0x193   :  { %v1229_v57 = vrot.slane %v1221_v49, %v1750_v19  ;;  %v1882_v58 = vrot.slane %v1222_v50, %v1750_v19  ;;  %v1077_v59 = vrot.slane %v1069_v51, %v1750_v19  ;;  %v1084_v60 = vrot.slane %v1070_v52, %v1750_v19 }
 0x194   :  { %v1093_v61 = vrot.slane %v1085_v55, %v1750_v19  ;;  %v1100_v62 = vrot.slane %v1086_v56, %v1750_v19 }
 0x195   :  { %v1269_v3 = vcombine.low %v1213_v53, %v1229_v57  ;;  %v1270_v4 = vcombine.high %v1213_v53, %v1229_v57  ;;  %v1285_v7 = vcombine.low %v1878_v54, %v1882_v58  ;;  %v1286_v8 = vcombine.high %v1878_v54, %v1882_v58  ;;  %v1534_v1 = vpop.f32.mrb[4].mxu0 }
 0x196   :  { %v1133_v5 = vcombine.low %v1077_v59, %v1093_v61  ;;  %v1134_v6 = vcombine.high %v1077_v59, %v1093_v61  ;;  %v1149_v0 = vcombine.low %v1084_v60, %v1100_v62  ;;  %v1150_v11 = vcombine.high %v1084_v60, %v1100_v62  ;;  %v1541_v10 = vpop.f32.mrb[4].mxu1  ;;  %v817_v12 = vpop.f32.mrb[5].mxu0 }
 0x197   :  { %v898_v14 = vpop.f32.mrb[5].mxu1  ;;  %v823_v26 = vadd.f32 %v1534_v1, %v413_v9  ;;  %v904_v27 = vadd.f32 %v1541_v10, %v415_v18  ;;  %v818_v28 = vadd.f32 %v817_v12, %v412_v20  ;;  %v1901_v30 = vrot.slane %v1269_v3, %v1761_v32 }
 0x198   :  { %v899_v31 = vadd.f32 %v898_v14, %v414_v21  ;;  %v1904_v36 = vrot.slane %v1149_v0, %v1761_v32  ;;  %v1284_v15 = vrot.slane %v1270_v4, %v1761_v32  ;;  %v1908_v17 = vrot.slane %v1285_v7, %v1761_v32 }
 0x199   :  { %v1911_v39 = vrot.slane %v1133_v5, %v1761_v32  ;;  %v1148_v43 = vrot.slane %v1134_v6, %v1761_v32  ;;  %v1300_v58 = vrot.slane %v1286_v8, %v1761_v32  ;;  %v1164_v59 = vrot.slane %v1150_v11, %v1761_v32 }
 0x19d   :  { %v1548_v29 = vpop.f32.mrb[6].mxu0 }
 0x19e   :  { %v985_v34 = vadd.f32 %v1548_v29, %v417_v22  ;;  %v1555_v33 = vpop.f32.mrb[6].mxu1  ;;  %v979_v35 = vpop.f32.mrb[7].mxu0 }
 0x19f   :  { %v1066_v37 = vadd.f32 %v1555_v33, %v419_v23  ;;  %v980_v38 = vadd.f32 %v979_v35, %v416_v24  ;;  %v1060_v13 = vpop.f32.mrb[7].mxu1 }
 0x1a0   :  { %v1237_v40 = vcombine.low %v823_v26, %v985_v34  ;;  %v1238_v41 = vcombine.high %v823_v26, %v985_v34  ;;  %v1061_v42 = vadd.f32 %v1060_v13, %v418_v25 }
 0x1a1   :  { %v1253_v44 = vcombine.low %v904_v27, %v1066_v37  ;;  %v1254_v45 = vcombine.high %v904_v27, %v1066_v37  ;;  %v1101_v46 = vcombine.low %v818_v28, %v980_v38  ;;  %v1102_v47 = vcombine.high %v818_v28, %v980_v38 }
 0x1a2   :  { %v1245_v48 = vrot.slane %v1237_v40, %v1750_v19  ;;  %v1252_v49 = vrot.slane %v1238_v41, %v1750_v19  ;;  %v1117_v50 = vcombine.low %v899_v31, %v1061_v42  ;;  %v1118_v51 = vcombine.high %v899_v31, %v1061_v42 }
 0x1a3   :  { %v1261_v52 = vrot.slane %v1253_v44, %v1750_v19  ;;  %v1268_v53 = vrot.slane %v1254_v45, %v1750_v19  ;;  %v1109_v54 = vrot.slane %v1101_v46, %v1750_v19  ;;  %v1116_v55 = vrot.slane %v1102_v47, %v1750_v19 }
 0x1a4   :  { %v1125_v56 = vrot.slane %v1117_v50, %v1750_v19  ;;  %v1132_v57 = vrot.slane %v1118_v51, %v1750_v19 }
 0x1a5   :  { %v1301_v60 = vcombine.low %v1245_v48, %v1261_v52  ;;  %v1302_v61 = vcombine.high %v1245_v48, %v1261_v52  ;;  %v1317_v62 = vcombine.low %v1252_v49, %v1268_v53  ;;  %v1318_v63 = vcombine.high %v1252_v49, %v1268_v53 }
 0x1a6   :  { %v1165_v2 = vcombine.low %v1109_v54, %v1125_v56  ;;  %v1166_v3 = vcombine.high %v1109_v54, %v1125_v56  ;;  %v1181_v4 = vcombine.low %v1116_v55, %v1132_v57  ;;  %v1182_v7 = vcombine.high %v1116_v55, %v1132_v57 }
 0x1a7   :  { %v1309_v1 = vrot.slane %v1301_v60, %v1761_v32  ;;  %v1316_v5 = vrot.slane %v1302_v61, %v1761_v32  ;;  %v1325_v6 = vrot.slane %v1317_v62, %v1761_v32  ;;  %v1332_v19 = vrot.slane %v1318_v63, %v1761_v32 }
 0x1a8   :  { %v1189_v8 = vrot.slane %v1181_v4, %v1761_v32  ;;  %v1173_v0 = vrot.slane %v1165_v2, %v1761_v32  ;;  %v1180_v11 = vrot.slane %v1166_v3, %v1761_v32  ;;  %v1196_v10 = vrot.slane %v1182_v7, %v1761_v32 }
 0x1a9   :  { %v1334_v12 = vcombine.high %v1901_v30, %v1309_v1  ;;  %v1335_v14 = vcombine.low %v1284_v15, %v1316_v5  ;;  %v1336_v16 = vcombine.high %v1284_v15, %v1316_v5  ;;  %v1337_v9 = vcombine.low %v1908_v17, %v1325_v6 }
 0x1aa   :  { %v1202_v18 = vcombine.high %v1904_v36, %v1189_v8  ;;  %v1198_v20 = vcombine.high %v1911_v39, %v1173_v0  ;;  %v1199_v21 = vcombine.low %v1148_v43, %v1180_v11  ;;  %v1200_v22 = vcombine.high %v1148_v43, %v1180_v11 }
 0x1ab   :  { %1370 = vrot.lane.b32.xlu1 %v1334_v12, %s1671_s23  ;;  %v1201_v23 = vcombine.low %v1904_v36, %v1189_v8  ;;  %v1338_v24 = vcombine.high %v1908_v17, %v1325_v6  ;;  %v1339_v25 = vcombine.low %v1300_v58, %v1332_v19  ;;  %v1203_v32 = vcombine.low %v1164_v59, %v1196_v10 }
 0x1ac   :  { %1358 = vrot.lane.b32.xlu0 %v1202_v18, %s1665_s18  ;;  %v1204_v26 = vcombine.high %v1164_v59, %v1196_v10  ;;  %v1340_v27 = vcombine.high %v1300_v58, %v1332_v19  ;;  %v1333_v28 = vcombine.low %v1901_v30, %v1309_v1  ;;  %v1197_v29 = vcombine.low %v1911_v39, %v1173_v0 }
 0x1af   :  { %1374 = vrot.lane.b32.xlu1 %v1335_v14, %s1669_s0 }
 0x1b3   :  { %1378 = vrot.lane.b32.xlu1 %v1336_v16, %s1670_s22 }
 0x1b7   :  { %1382 = vrot.lane.b32.xlu1 %v1337_v9, %s1667_s20 }
 0x1bb   :  { %1342 = vrot.lane.b32.xlu1 %v1198_v20, %s1671_s23 }
 0x1bf   :  { %1346 = vrot.lane.b32.xlu1 %v1199_v21, %s1669_s0 }
 0x1c3   :  { %1350 = vrot.lane.b32.xlu1 %v1200_v22, %s1670_s22 }
 0x1c7   :  { %1354 = vrot.lane.b32.xlu1 %v1201_v23, %s1667_s20 }
 0x1cb   :  { %1386 = vrot.lane.b32.xlu1 %v1338_v24, %s1665_s18 }
 0x1cf   :  { %1390 = vrot.lane.b32.xlu1 %v1339_v25, %s1668_s21 }
 0x1d3   :  { %1362 = vrot.lane.b32.xlu1 %v1203_v32, %s1668_s21 }
 0x1d7   :  { %1366 = vrot.lane.b32.xlu1 %v1204_v26, %s1666_s19 }
 0x1db   :  { %1394 = vrot.lane.b32.xlu1 %v1340_v27, %s1666_s19 }
 0x21d   :  { %v1371_v30 = vpop.permute.xlu1 %1370 }
 0x21e   :  { %v1359_v43 = vpop.permute.xlu0 %1358  ;;  %v1410_v44 = vsel %vm420_vm0, %v1333_v28, %v1371_v30 }
 0x221   :  { %v1375_v31 = vpop.permute.xlu1 %1374 }
 0x222   :  { %v1411_v46 = vsel %vm1398_vm4, %v1410_v44, %v1375_v31 }
 0x225   :  { %v1379_v34 = vpop.permute.xlu1 %1378 }
 0x226   :  { %v1412_v49 = vsel %vm1400_vm5, %v1411_v46, %v1379_v34 }
 0x229   :  { %v1383_v33 = vpop.permute.xlu1 %1382 }
 0x22a   :  { %v1413_v51 = vsel %vm1402_vm6, %v1412_v49, %v1383_v33 }
 0x22d   :  { %v1343_v35 = vpop.permute.xlu1 %1342 }
 0x22e   :  { %v1397_v17 = vsel %vm420_vm0, %v1197_v29, %v1343_v35 }
 0x231   :  { %v1347_v36 = vpop.permute.xlu1 %1346 }
 0x232   :  { %v1399_v39 = vsel %vm1398_vm4, %v1397_v17, %v1347_v36 }
 0x235   :  { %v1351_v15 = vpop.permute.xlu1 %1350 }
 0x236   :  { %v1401_v40 = vsel %vm1400_vm5, %v1399_v39, %v1351_v15 }
 0x239   :  { %v1355_v37 = vpop.permute.xlu1 %1354 }
 0x23a   :  { %v1403_v41 = vsel %vm1402_vm6, %v1401_v40, %v1355_v37 }
 0x23b   :  { %v1405_v45 = vsel %vm1404_vm7, %v1403_v41, %v1359_v43 }
 0x23d   :  { %v1387_v38 = vpop.permute.xlu1 %1386 }
 0x23e   :  { %v1414_v52 = vsel %vm1404_vm7, %v1413_v51, %v1387_v38 }
 0x241   :  { %v1391_v13 = vpop.permute.xlu1 %1390 }
 0x242   :  { %v1415_v53 = vsel %vm1406_vm9, %v1414_v52, %v1391_v13 }
 0x245   :  { %v1363_v42 = vpop.permute.xlu1 %1362 }
 0x246   :  { %v1407_v47 = vsel %vm1406_vm9, %v1405_v45, %v1363_v42 }
 0x249   :  { %v1367_v48 = vpop.permute.xlu1 %1366 }
 0x24a   :  { %v1409_v50 = vsel %vm1408_vm8, %v1407_v47, %v1367_v48 }
 0x24b   :  { %1417 = vst [vmem:[#allocation5] sm:$0xff] %v1409_v50 }
 0x24d   :  { %v1395_v54 = vpop.permute.xlu1 %1394 }
 0x24e   :  { %v1416_v55 = vsel %vm1408_vm8, %v1415_v53, %v1395_v54 }
 0x24f   :  { %1418 = vst [vmem:[#allocation5 + $0x8] sm:$0xff] %v1416_v55 }
 0x250   :  { %1649 = shalt.err (!%p1646_p12)
}
 0x251   :  { %s1650_s29 = scalar_lea.hbm %s1975_s1, 256 }
 0x252   :  { %p1651_p13 = scmp.ne.s32.totalorder %s1975_s1, %s1650_s29  ;;  %p1654_p0 = scmp.lt.u32.totalorder %s1650_s29, %s1975_s1 }
 0x254   :  { %p1656_p1 = pnand %p1654_p0, %p1651_p13 }
 0x256   :  { %1659 = shalt.err (!%p1656_p1)
}
 0x257   :  { %1428 = dma.vmem_to_hbm [thread:$0]  %s1426_s25, 256, %s1975_s1, [#allocation4]  }
 0x258   :  { %1662 = dma.done.wait [#allocation4], 256  }
 0x259   :  { %1663 = vsyncadd [#allocation4], 4294967040 }
 0x25a   :  { %1432 = vsyncpa [#allocation3], 1 }
 0x25b   :  { %1433 = vsyncpa [#allocation4], 1 }

</bundles_post_ra>
